<compile_context>
chip_gen: v7x
topology: tpu7x:2x2x1
jax: 0.10.0
libtpu: 0.0.40
codegen_flags: <defaults>
</compile_context>

<pallas_src>
import jax
import jax.numpy as jnp
from jax.experimental import pallas as pl
from jax.experimental.pallas import tpu as pltpu

ROWS = 8          # feature rows padded to a sublane multiple (4 real)
PCOLS = 128       # packed-parameter slab lane width
MAX_TM = 8192     # max batch lanes per grid step (8*TM*4B*2buf ~ 512 KiB VMEM)

# Column layout of the packed parameter slab P (8, 128):
#   cols 0..3  : W1 columns  (W1[r, c] at P[r, c],       r < 5)
#   col  4     : b1          (P[r, 4],                   r < 5)
#   cols 5..9  : W2 columns  (W2[r, c] at P[r, 5 + c],   r < 4)
#   col  10    : b2          (P[r, 10],                  r < 4)
#   cols 11..14: W3 columns  (W3[0, c] at P[0, 11 + c])
#   col  15    : b3          (P[0, 15])
_W1, _B1, _W2, _B2, _W3, _B3 = 0, 4, 5, 10, 11, 15


def _mlp_kernel(p_ref, x_ref, o_ref):
    """One batch tile: x_ref (8, TM) -> o_ref (1, TM), batch on the lane axis."""
    tm = x_ref.shape[1]
    P = p_ref[...]              # (8, 128) packed weights/biases (f32)
    x = x_ref[...]              # (8, TM); rows 0..3 are the real features

    def dense(act, w_col0, b_col, n_in):
        # out[r, j] = b[r] + sum_c W[r, c] * act[c, j]
        # computed as VPU outer-product multiply-adds on (8, TM) vregs
        # (padded rows of P are zero, so padded output rows stay zero).
        acc = jnp.broadcast_to(P[:, b_col:b_col + 1], (ROWS, tm))
        for c in range(n_in):
            acc = acc + P[:, w_col0 + c:w_col0 + c + 1] * act[c:c + 1, :]
        return acc

    a1 = jnp.maximum(dense(x, _W1, _B1, 4), 0.0)    # rows 0..4 real
    a2 = jnp.maximum(dense(a1, _W2, _B2, 5), 0.0)   # rows 0..3 real
    a3 = dense(a2, _W3, _B3, 4)                     # row 0 is the real output
    o_ref[...] = a3[0:1, :]                         # lane-dense (1, TM) store


def _round_up(n, m):
    return ((n + m - 1) // m) * m


def _pack_params(p):
    P = jnp.zeros((ROWS, PCOLS), jnp.float32)
    P = P.at[:5, _W1:_W1 + 4].set(p["w1"].astype(jnp.float32))
    P = P.at[:5, _B1].set(p["b1"].astype(jnp.float32))
    P = P.at[:4, _W2:_W2 + 5].set(p["w2"].astype(jnp.float32))
    P = P.at[:4, _B2].set(p["b2"].astype(jnp.float32))
    P = P.at[:1, _W3:_W3 + 4].set(p["w3"].astype(jnp.float32))
    P = P.at[:1, _B3].set(p["b3"].astype(jnp.float32))
    return P


@jax.jit
def house3_forward(x, params):
    """x: (B, 4) float32; params: torch-convention (out,in) weights -> (B, 1)."""
    B = x.shape[0]
    TM = min(MAX_TM, _round_up(B, 128))   # lanes per grid step
    b_pad = _round_up(B, TM)
    n_blocks = b_pad // TM

    # Transposed, lane-dense input: (8, b_pad), batch on the 128-lane axis.
    # Only the tiny (4, B) transpose is padded (2x, not 32x like before).
    xT = jnp.pad(x.astype(jnp.float32).T, ((0, ROWS - 4), (0, b_pad - B)))
    P = _pack_params(params)

    out = pl.pallas_call(
        _mlp_kernel,
        out_shape=jax.ShapeDtypeStruct((1, b_pad), jnp.float32),
        grid=(n_blocks,),
        in_specs=[
            pl.BlockSpec((ROWS, PCOLS), lambda i: (0, 0)),   # packed params, resident
            pl.BlockSpec((ROWS, TM), lambda i: (0, i)),      # x tile (batch on lanes)
        ],
        out_specs=pl.BlockSpec((1, TM), lambda i: (0, i)),   # lane-dense output row
        compiler_params=pltpu.CompilerParams(
            dimension_semantics=("parallel",),               # v7x: shard across 2 TCs
            vmem_limit_bytes=16 * 1024 * 1024,               # explicit, v7x-safe
        ),
    )(P, xT)

    # Slice off lane padding and return torch-shaped (B, 1).
    return out[0, :B][:, None]


def init_params(key):
    """Deterministic init mirroring nn.Linear's U(-1/sqrt(fan_in), +1/sqrt(fan_in))."""
    ks = jax.random.split(key, 6)

    def lin(kw, kb, out_f, in_f):
        bound = 1.0 / jnp.sqrt(in_f)
        w = jax.random.uniform(kw, (out_f, in_f), jnp.float32, -bound, bound)
        b = jax.random.uniform(kb, (out_f,), jnp.float32, -bound, bound)
        return w, b

    w1, b1 = lin(ks[0], ks[1], 5, 4)
    w2, b2 = lin(ks[2], ks[3], 4, 5)
    w3, b3 = lin(ks[4], ks[5], 1, 4)
    return {"w1": w1, "b1": b1, "w2": w2, "b2": b2, "w3": w3, "b3": b3}


def reference_forward(x, p):
    h = jnp.maximum(x @ p["w1"].T + p["b1"], 0.0)
    h = jnp.maximum(h @ p["w2"].T + p["b2"], 0.0)
    return h @ p["w3"].T + p["b3"]


if __name__ == "__main__":
    key = jax.random.PRNGKey(0)
    k_x, k_x2, k_p = jax.random.split(key, 3)

    params = init_params(k_p)

    # Small demo batch (matches nn.Linear(4, ...) input convention).
    x = jax.random.normal(k_x, (8, 4), jnp.float32)
    out = jax.block_until_ready(house3_forward(x, params))
    ref = reference_forward(x, params)
    assert out.shape == (8, 1), out.shape
    assert jnp.allclose(out, ref, atol=1e-5, rtol=1e-5)

    # Second shape exercising non-multiple-of-128 lane padding.
    x2 = jax.random.normal(k_x2, (200, 4), jnp.float32)
    out2 = jax.block_until_ready(house3_forward(x2, params))
    ref2 = reference_forward(x2, params)
    assert out2.shape == (200, 1), out2.shape
    assert jnp.allclose(out2, ref2, atol=1e-5, rtol=1e-5)

    print("KERNEL_OK")
</pallas_src>

<mosaic_0001>
module attributes {stable_mosaic.version = 11 : i64} {
  func.func @_mlp_kernel(%arg0: i32, %arg1: memref<8x128xf32, #tpu.memory_space<vmem>>, %arg2: memref<8x128xf32, #tpu.memory_space<vmem>>, %arg3: memref<1x128xf32, #tpu.memory_space<vmem>>) attributes {dimension_semantics = [#tpu.dimension_semantics<parallel>], iteration_bounds = array<i64: 1>, scalar_prefetch = 0 : i64, scratch_operands = 0 : i64, tpu.core_type = #tpu.core_type<tc>, window_params = [{pipeline_mode = #tpu.pipeline_mode<synchronous>, transform_indices = @transform_0, window_bounds = array<i64: 8, 128>}, {transform_indices = @transform_1, window_bounds = array<i64: 8, 128>}, {transform_indices = @transform_2, window_bounds = array<i64: 1, 128>}]} {
    %c0 = arith.constant 0 : index
    %c0_0 = arith.constant 0 : index
    %0 = vector.load %arg1[%c0, %c0_0] : memref<8x128xf32, #tpu.memory_space<vmem>>, vector<8x128xf32>
    %c0_1 = arith.constant 0 : index
    %c0_2 = arith.constant 0 : index
    %1 = vector.load %arg2[%c0_1, %c0_2] : memref<8x128xf32, #tpu.memory_space<vmem>>, vector<8x128xf32>
    %2 = vector.extract_strided_slice %0 {offsets = [0, 4], sizes = [8, 1], strides = [1, 1]} : vector<8x128xf32> to vector<8x1xf32>
    %3 = vector.shape_cast %2 : vector<8x1xf32> to vector<8x1xf32>
    %4 = vector.broadcast %3 : vector<8x1xf32> to vector<8x128xf32>
    %5 = vector.extract_strided_slice %0 {offsets = [0, 0], sizes = [8, 1], strides = [1, 1]} : vector<8x128xf32> to vector<8x1xf32>
    %6 = vector.extract_strided_slice %1 {offsets = [0, 0], sizes = [1, 128], strides = [1, 1]} : vector<8x128xf32> to vector<1x128xf32>
    %7 = vector.broadcast %5 : vector<8x1xf32> to vector<8x128xf32>
    %8 = vector.broadcast %6 : vector<1x128xf32> to vector<8x128xf32>
    %9 = arith.mulf %7, %8 : vector<8x128xf32>
    %10 = arith.addf %4, %9 : vector<8x128xf32>
    %11 = vector.extract_strided_slice %0 {offsets = [0, 1], sizes = [8, 1], strides = [1, 1]} : vector<8x128xf32> to vector<8x1xf32>
    %12 = vector.extract_strided_slice %1 {offsets = [1, 0], sizes = [1, 128], strides = [1, 1]} : vector<8x128xf32> to vector<1x128xf32>
    %13 = vector.broadcast %11 : vector<8x1xf32> to vector<8x128xf32>
    %14 = vector.broadcast %12 : vector<1x128xf32> to vector<8x128xf32>
    %15 = arith.mulf %13, %14 : vector<8x128xf32>
    %16 = arith.addf %10, %15 : vector<8x128xf32>
    %17 = vector.extract_strided_slice %0 {offsets = [0, 2], sizes = [8, 1], strides = [1, 1]} : vector<8x128xf32> to vector<8x1xf32>
    %18 = vector.extract_strided_slice %1 {offsets = [2, 0], sizes = [1, 128], strides = [1, 1]} : vector<8x128xf32> to vector<1x128xf32>
    %19 = vector.broadcast %17 : vector<8x1xf32> to vector<8x128xf32>
    %20 = vector.broadcast %18 : vector<1x128xf32> to vector<8x128xf32>
    %21 = arith.mulf %19, %20 : vector<8x128xf32>
    %22 = arith.addf %16, %21 : vector<8x128xf32>
    %23 = vector.extract_strided_slice %0 {offsets = [0, 3], sizes = [8, 1], strides = [1, 1]} : vector<8x128xf32> to vector<8x1xf32>
    %24 = vector.extract_strided_slice %1 {offsets = [3, 0], sizes = [1, 128], strides = [1, 1]} : vector<8x128xf32> to vector<1x128xf32>
    %25 = vector.broadcast %23 : vector<8x1xf32> to vector<8x128xf32>
    %26 = vector.broadcast %24 : vector<1x128xf32> to vector<8x128xf32>
    %27 = arith.mulf %25, %26 : vector<8x128xf32>
    %28 = arith.addf %22, %27 : vector<8x128xf32>
    %cst = arith.constant 0.000000e+00 : f32
    %29 = vector.broadcast %cst : f32 to vector<8x128xf32>
    %30 = arith.maximumf %28, %29 : vector<8x128xf32>
    %31 = vector.extract_strided_slice %0 {offsets = [0, 10], sizes = [8, 1], strides = [1, 1]} : vector<8x128xf32> to vector<8x1xf32>
    %32 = vector.shape_cast %31 : vector<8x1xf32> to vector<8x1xf32>
    %33 = vector.broadcast %32 : vector<8x1xf32> to vector<8x128xf32>
    %34 = vector.extract_strided_slice %0 {offsets = [0, 5], sizes = [8, 1], strides = [1, 1]} : vector<8x128xf32> to vector<8x1xf32>
    %35 = vector.extract_strided_slice %30 {offsets = [0, 0], sizes = [1, 128], strides = [1, 1]} : vector<8x128xf32> to vector<1x128xf32>
    %36 = vector.broadcast %34 : vector<8x1xf32> to vector<8x128xf32>
    %37 = vector.broadcast %35 : vector<1x128xf32> to vector<8x128xf32>
    %38 = arith.mulf %36, %37 : vector<8x128xf32>
    %39 = arith.addf %33, %38 : vector<8x128xf32>
    %40 = vector.extract_strided_slice %0 {offsets = [0, 6], sizes = [8, 1], strides = [1, 1]} : vector<8x128xf32> to vector<8x1xf32>
    %41 = vector.extract_strided_slice %30 {offsets = [1, 0], sizes = [1, 128], strides = [1, 1]} : vector<8x128xf32> to vector<1x128xf32>
    %42 = vector.broadcast %40 : vector<8x1xf32> to vector<8x128xf32>
    %43 = vector.broadcast %41 : vector<1x128xf32> to vector<8x128xf32>
    %44 = arith.mulf %42, %43 : vector<8x128xf32>
    %45 = arith.addf %39, %44 : vector<8x128xf32>
    %46 = vector.extract_strided_slice %0 {offsets = [0, 7], sizes = [8, 1], strides = [1, 1]} : vector<8x128xf32> to vector<8x1xf32>
    %47 = vector.extract_strided_slice %30 {offsets = [2, 0], sizes = [1, 128], strides = [1, 1]} : vector<8x128xf32> to vector<1x128xf32>
    %48 = vector.broadcast %46 : vector<8x1xf32> to vector<8x128xf32>
    %49 = vector.broadcast %47 : vector<1x128xf32> to vector<8x128xf32>
    %50 = arith.mulf %48, %49 : vector<8x128xf32>
    %51 = arith.addf %45, %50 : vector<8x128xf32>
    %52 = vector.extract_strided_slice %0 {offsets = [0, 8], sizes = [8, 1], strides = [1, 1]} : vector<8x128xf32> to vector<8x1xf32>
    %53 = vector.extract_strided_slice %30 {offsets = [3, 0], sizes = [1, 128], strides = [1, 1]} : vector<8x128xf32> to vector<1x128xf32>
    %54 = vector.broadcast %52 : vector<8x1xf32> to vector<8x128xf32>
    %55 = vector.broadcast %53 : vector<1x128xf32> to vector<8x128xf32>
    %56 = arith.mulf %54, %55 : vector<8x128xf32>
    %57 = arith.addf %51, %56 : vector<8x128xf32>
    %58 = vector.extract_strided_slice %0 {offsets = [0, 9], sizes = [8, 1], strides = [1, 1]} : vector<8x128xf32> to vector<8x1xf32>
    %59 = vector.extract_strided_slice %30 {offsets = [4, 0], sizes = [1, 128], strides = [1, 1]} : vector<8x128xf32> to vector<1x128xf32>
    %60 = vector.broadcast %58 : vector<8x1xf32> to vector<8x128xf32>
    %61 = vector.broadcast %59 : vector<1x128xf32> to vector<8x128xf32>
    %62 = arith.mulf %60, %61 : vector<8x128xf32>
    %63 = arith.addf %57, %62 : vector<8x128xf32>
    %cst_3 = arith.constant 0.000000e+00 : f32
    %64 = vector.broadcast %cst_3 : f32 to vector<8x128xf32>
    %65 = arith.maximumf %63, %64 : vector<8x128xf32>
    %66 = vector.extract_strided_slice %0 {offsets = [0, 15], sizes = [8, 1], strides = [1, 1]} : vector<8x128xf32> to vector<8x1xf32>
    %67 = vector.shape_cast %66 : vector<8x1xf32> to vector<8x1xf32>
    %68 = vector.broadcast %67 : vector<8x1xf32> to vector<8x128xf32>
    %69 = vector.extract_strided_slice %0 {offsets = [0, 11], sizes = [8, 1], strides = [1, 1]} : vector<8x128xf32> to vector<8x1xf32>
    %70 = vector.extract_strided_slice %65 {offsets = [0, 0], sizes = [1, 128], strides = [1, 1]} : vector<8x128xf32> to vector<1x128xf32>
    %71 = vector.broadcast %69 : vector<8x1xf32> to vector<8x128xf32>
    %72 = vector.broadcast %70 : vector<1x128xf32> to vector<8x128xf32>
    %73 = arith.mulf %71, %72 : vector<8x128xf32>
    %74 = arith.addf %68, %73 : vector<8x128xf32>
    %75 = vector.extract_strided_slice %0 {offsets = [0, 12], sizes = [8, 1], strides = [1, 1]} : vector<8x128xf32> to vector<8x1xf32>
    %76 = vector.extract_strided_slice %65 {offsets = [1, 0], sizes = [1, 128], strides = [1, 1]} : vector<8x128xf32> to vector<1x128xf32>
    %77 = vector.broadcast %75 : vector<8x1xf32> to vector<8x128xf32>
    %78 = vector.broadcast %76 : vector<1x128xf32> to vector<8x128xf32>
    %79 = arith.mulf %77, %78 : vector<8x128xf32>
    %80 = arith.addf %74, %79 : vector<8x128xf32>
    %81 = vector.extract_strided_slice %0 {offsets = [0, 13], sizes = [8, 1], strides = [1, 1]} : vector<8x128xf32> to vector<8x1xf32>
    %82 = vector.extract_strided_slice %65 {offsets = [2, 0], sizes = [1, 128], strides = [1, 1]} : vector<8x128xf32> to vector<1x128xf32>
    %83 = vector.broadcast %81 : vector<8x1xf32> to vector<8x128xf32>
    %84 = vector.broadcast %82 : vector<1x128xf32> to vector<8x128xf32>
    %85 = arith.mulf %83, %84 : vector<8x128xf32>
    %86 = arith.addf %80, %85 : vector<8x128xf32>
    %87 = vector.extract_strided_slice %0 {offsets = [0, 14], sizes = [8, 1], strides = [1, 1]} : vector<8x128xf32> to vector<8x1xf32>
    %88 = vector.extract_strided_slice %65 {offsets = [3, 0], sizes = [1, 128], strides = [1, 1]} : vector<8x128xf32> to vector<1x128xf32>
    %89 = vector.broadcast %87 : vector<8x1xf32> to vector<8x128xf32>
    %90 = vector.broadcast %88 : vector<1x128xf32> to vector<8x128xf32>
    %91 = arith.mulf %89, %90 : vector<8x128xf32>
    %92 = arith.addf %86, %91 : vector<8x128xf32>
    %93 = vector.extract_strided_slice %92 {offsets = [0, 0], sizes = [1, 128], strides = [1, 1]} : vector<8x128xf32> to vector<1x128xf32>
    %c0_4 = arith.constant 0 : index
    %c0_5 = arith.constant 0 : index
    %94 = vector.load %arg3[%c0_4, %c0_5] : memref<1x128xf32, #tpu.memory_space<vmem>>, vector<1x128xf32>
    tpu.vector_store %arg3[%c0_4, %c0_5], %93 {strides = array<i32>} : memref<1x128xf32, #tpu.memory_space<vmem>>, vector<1x128xf32>,
    return
  }
  func.func @transform_0(%arg0: i32) -> (i32, i32) {
    %c0_i32 = arith.constant 0 : i32
    %c0_i32_0 = arith.constant 0 : i32
    %c0_i32_1 = arith.constant 0 : i32
    return %c0_i32, %c0_i32_0 : i32, i32
  }
  func.func @transform_1(%arg0: i32) -> (i32, i32) {
    %c0_i32 = arith.constant 0 : i32
    %c0_i32_0 = arith.constant 0 : i32
    return %c0_i32, %arg0 : i32, i32
  }
  func.func @transform_2(%arg0: i32) -> (i32, i32) {
    %c0_i32 = arith.constant 0 : i32
    %c0_i32_0 = arith.constant 0 : i32
    return %c0_i32, %arg0 : i32, i32
  }
}

</mosaic_0001>

<bundles_post_ra>
// kernel: house3_forward.1
= control target key start
LH: loop header
LB: loop body
LE: loop exit
PB: predicated region body
PF: predicated region fallthrough
CT: control target
= control target key end

     0   :  { %v196_v0 = vmov 1   ;;  %v197_v1 = vmov 0   ;;  %v198_v3 = vmov 2   ;;  %v199_v4 = vmov 4   ;;  %s236_s0 = inlined_call_operand.vmem [shape: f32[8,128], index: 0, kind: input, shape index: {}]   ;;  %s237_s1 = inlined_call_operand.vmem [shape: f32[8,128], index: 1, kind: input, shape index: {}]   ;;  %s238_s2 = inlined_call_operand.vmem [shape: f32[1,128], index: 2, kind: output, shape index: {}]  }
   0x1   :  { %181 = vset.pattern.permute.xlu1 %v196_v0  ;;  %179 = vset.pattern.permute.xlu0 %v197_v1  ;;  %v11_v2 = vld [vmem:[%s236_s0] sm:$0xff]  ;;  %v200_v5 = vmov 3   ;;  %v201_v6 = vmov 5   ;;  %v202_v7 = vmov 10   ;;  %v203_v8 = vmov 7  }
   0x2   :  { %29 = vperm.xlu1 %181, %v11_v2   ;;  %19 = vperm.xlu0 %179, %v11_v2   ;;  %v204_v9 = vmov 6   ;;  %v205_v10 = vmov 11   ;;  %v206_v11 = vmov 8   ;;  %v207_v12 = vmov 13   ;;  %v12_v20 = vld [vmem:[%s237_s1] sm:$0xff] }
   0x3   :  { %v208_v13 = vmov 9   ;;  %v209_v14 = vmov 14   ;;  %v210_v15 = vmov 15   ;;  %v211_v16 = vmov 12  }
   0x4   :  { %v22_v17 = vlaneseq }
   0x6   :  { %182 = vset.pattern.permute.xlu1 %v198_v3  ;;  %180 = vset.pattern.permute.xlu0 %v199_v4  ;;  %v23_v18 = vshrl.u32 %v22_v17, 7 }
   0x7   :  { %39 = vperm.xlu1 %182, %v11_v2   ;;  %15 = vperm.xlu0 %180, %v11_v2  }
   0x8   :  { %v24_v19 = vsub.s32 0, %v23_v18  ;;  %v34_v21 = vsub.s32 1, %v23_v18  ;;  %v44_v25 = vsub.s32 2, %v23_v18  ;;  %v54_v28 = vsub.s32 3, %v23_v18 }
   0x9   :  { %v109_v56 = vsub.s32 4, %v23_v18 }
   0xa   :  { %v25_v22 = vrot.slane %v12_v20, %v24_v19  ;;  %v35_v26 = vrot.slane %v12_v20, %v34_v21  ;;  %v45_v29 = vrot.slane %v12_v20, %v44_v25  ;;  %v55_v34 = vrot.slane %v12_v20, %v54_v28 }
   0xb   :  { %183 = vset.pattern.permute.xlu1 %v200_v5  ;;  %184 = vset.pattern.permute.xlu0 %v201_v6 }
   0xc   :  { %49 = vperm.xlu1 %183, %v11_v2   ;;  %64 = vperm.xlu0 %184, %v11_v2  }
  0x10   :  { %185 = vset.pattern.permute.xlu1 %v202_v7  ;;  %187 = vset.pattern.permute.xlu0 %v203_v8 }
  0x11   :  { %60 = vperm.xlu1 %185, %v11_v2   ;;  %84 = vperm.xlu0 %187, %v11_v2  }
  0x15   :  { %186 = vset.pattern.permute.xlu1 %v204_v9  ;;  %190 = vset.pattern.permute.xlu0 %v205_v10 }
  0x16   :  { %74 = vperm.xlu1 %186, %v11_v2   ;;  %119 = vperm.xlu0 %190, %v11_v2  }
  0x1a   :  { %188 = vset.pattern.permute.xlu1 %v206_v11  ;;  %193 = vset.pattern.permute.xlu0 %v207_v12 }
  0x1b   :  { %94 = vperm.xlu1 %188, %v11_v2   ;;  %139 = vperm.xlu0 %193, %v11_v2  }
  0x1f   :  { %189 = vset.pattern.permute.xlu1 %v208_v13  ;;  %195 = vset.pattern.permute.xlu0 %v209_v14 }
  0x20   :  { %104 = vperm.xlu1 %189, %v11_v2  }
  0x24   :  { %191 = vset.pattern.permute.xlu1 %v210_v15 }
  0x25   :  { %115 = vperm.xlu1 %191, %v11_v2  }
  0x29   :  { %192 = vset.pattern.permute.xlu1 %v211_v16 }
  0x2a   :  { %129 = vperm.xlu1 %192, %v11_v2  }
  0x2e   :  { %194 = vset.pattern.permute.xlu1 %v209_v14 }
  0x2f   :  { %149 = vperm.xlu1 %194, %v11_v2  }
  0x81   :  { %v30_v23 = vpop.permute.xlu1 %29  ;;  %v20_v24 = vpop.permute.xlu0 %19 }
  0x82   :  { %v26_v27 = vmul.f32 %v25_v22, %v20_v24  ;;  %v36_v32 = vmul.f32 %v35_v26, %v30_v23 }
  0x86   :  { %v40_v30 = vpop.permute.xlu1 %39  ;;  %v16_v31 = vpop.permute.xlu0 %15 }
  0x87   :  { %v27_v33 = vadd.f32 %v26_v27, %v16_v31  ;;  %v46_v35 = vmul.f32 %v45_v29, %v40_v30 }
  0x89   :  { %v37_v36 = vadd.f32 %v36_v32, %v27_v33 }
  0x8b   :  { %v50_v37 = vpop.permute.xlu1 %49  ;;  %v47_v38 = vadd.f32 %v46_v35, %v37_v36  ;;  %v65_v43 = vpop.permute.xlu0 %64 }
  0x8c   :  { %v56_v39 = vmul.f32 %v55_v34, %v50_v37 }
  0x8e   :  { %v57_v40 = vadd.f32 %v56_v39, %v47_v38 }
  0x90   :  { %v58_v41 = vmax.f32 %v57_v40, 0.0  ;;  %v61_v42 = vpop.permute.xlu1 %60  ;;  %v85_v51 = vpop.permute.xlu0 %84 }
  0x92   :  { %v70_v44 = vrot.slane %v58_v41, %v24_v19  ;;  %v80_v46 = vrot.slane %v58_v41, %v34_v21  ;;  %v90_v49 = vrot.slane %v58_v41, %v44_v25  ;;  %v100_v55 = vrot.slane %v58_v41, %v54_v28 }
  0x93   :  { %v110_v59 = vrot.slane %v58_v41, %v109_v56 }
  0x94   :  { %v71_v45 = vmul.f32 %v70_v44, %v65_v43  ;;  %v91_v53 = vmul.f32 %v90_v49, %v85_v51 }
  0x95   :  { %v75_v47 = vpop.permute.xlu1 %74  ;;  %v120_v0 = vpop.permute.xlu0 %119 }
  0x96   :  { %v72_v48 = vadd.f32 %v71_v45, %v61_v42  ;;  %v81_v50 = vmul.f32 %v80_v46, %v75_v47 }
  0x98   :  { %v82_v52 = vadd.f32 %v81_v50, %v72_v48 }
  0x9a   :  { %v95_v54 = vpop.permute.xlu1 %94  ;;  %v92_v57 = vadd.f32 %v91_v53, %v82_v52  ;;  %v140_v7 = vpop.permute.xlu0 %139 }
  0x9b   :  { %v101_v58 = vmul.f32 %v100_v55, %v95_v54 }
  0x9d   :  { %v102_v61 = vadd.f32 %v101_v58, %v92_v57 }
  0x9f   :  { %v105_v60 = vpop.permute.xlu1 %104 }
  0xa0   :  { %v111_v62 = vmul.f32 %v110_v59, %v105_v60 }
  0xa2   :  { %v112_v63 = vadd.f32 %v111_v62, %v102_v61 }
  0xa4   :  { %v113_v1 = vmax.f32 %v112_v63, 0.0  ;;  %v116_v2 = vpop.permute.xlu1 %115 }
  0xa6   :  { %v125_v3 = vrot.slane %v113_v1, %v24_v19  ;;  %v145_v5 = vrot.slane %v113_v1, %v44_v25  ;;  %v135_v6 = vrot.slane %v113_v1, %v34_v21  ;;  %v155_v13 = vrot.slane %v113_v1, %v54_v28 }
  0xa8   :  { %v126_v4 = vmul.f32 %v125_v3, %v120_v0  ;;  %v146_v11 = vmul.f32 %v145_v5, %v140_v7 }
  0xa9   :  { %v130_v8 = vpop.permute.xlu1 %129 }
  0xaa   :  { %v127_v9 = vadd.f32 %v126_v4, %v116_v2  ;;  %v136_v10 = vmul.f32 %v135_v6, %v130_v8 }
  0xac   :  { %v137_v12 = vadd.f32 %v136_v10, %v127_v9 }
  0xae   :  { %v150_v14 = vpop.permute.xlu1 %149  ;;  %v147_v15 = vadd.f32 %v146_v11, %v137_v12 }
  0xaf   :  { %v156_v16 = vmul.f32 %v155_v13, %v150_v14 }
  0xb1   :  { %v157_v17 = vadd.f32 %v156_v16, %v147_v15 }
  0xb3   :  { %158 = vst [vmem:[%s238_s2] sm:$0x1] %v157_v17 }

</bundles_post_ra>
